<compile_context>
chip_gen: v7x
topology: tpu7x:2x2x1
jax: 0.10.0
libtpu: 0.0.40
codegen_flags: <defaults>
</compile_context>

<pallas_src>
import jax
import jax.numpy as jnp
from jax.experimental import pallas as pl
from jax.experimental.pallas import tpu as pltpu


_LAYER_DIMS = [(784, 256), (256, 128), (128, 64), (64, 10)]


def _round_up(n, m):
    return ((n + m - 1) // m) * m


def _mlp_kernel(x_ref,
                w1_ref, b1_ref,
                w2_ref, b2_ref,
                w3_ref, b3_ref,
                w4_ref, b4_ref,
                o_ref):
    # x_ref: (TILE_B, 784) f32 block; cast to bf16 here (no wrapper copy).
    # Weights bf16, biases f32 (1, N).  Accumulate in f32 on the MXU.
    x = x_ref[...].astype(jnp.bfloat16)

    h = jnp.dot(x, w1_ref[...], preferred_element_type=jnp.float32) + b1_ref[...]
    h = jnp.maximum(h, 0.0).astype(jnp.bfloat16)

    h = jnp.dot(h, w2_ref[...], preferred_element_type=jnp.float32) + b2_ref[...]
    h = jnp.maximum(h, 0.0).astype(jnp.bfloat16)

    h = jnp.dot(h, w3_ref[...], preferred_element_type=jnp.float32) + b3_ref[...]
    h = jnp.maximum(h, 0.0).astype(jnp.bfloat16)

    logits = jnp.dot(h, w4_ref[...], preferred_element_type=jnp.float32) + b4_ref[...]

    # log_softmax over dim=1 (class dimension), numerically stable, in f32.
    m = jnp.max(logits, axis=1, keepdims=True)
    shifted = logits - m
    lse = jnp.log(jnp.sum(jnp.exp(shifted), axis=1, keepdims=True))
    o_ref[...] = (shifted - lse).astype(o_ref.dtype)


def _choose_tile(batch, tile_b):
    """Batch-tile size: multiple of 8 sublanes, capped at ceil(B/2) so the
    grid has at least 2 steps when the batch allows it (keeps both v7x
    TensorCores busy under the 'parallel' dimension semantics)."""
    half = _round_up(max(1, -(-batch // 2)), 8)
    return max(8, min(_round_up(tile_b, 8), half))


def classifier_forward(x, params, *, tile_b=2048):
    """x: (B, 1, 28, 28) or (B, 784) float32.  Returns (B, 10) float32 log-probs."""
    B = x.shape[0]
    x2d = x.reshape(B, -1)                    # x.view(x.shape[0], -1); stays f32,
    assert x2d.shape[1] == 784, x2d.shape     # bf16 cast happens inside the kernel.

    (w1, b1), (w2, b2), (w3, b3), (w4, b4) = params
    # Weights are tiny (~0.5 MiB total) -> one-off bf16 cast here is free.
    w1b, w2b, w3b, w4b = (w.astype(jnp.bfloat16) for w in (w1, w2, w3, w4))

    tb = _choose_tile(B, tile_b)
    # No jnp.pad: ragged last block is handled by Pallas (OOB rows masked on
    # writeback; rows are independent so nothing leaks into valid rows).
    grid = (pl.cdiv(B, tb),)

    x_spec = pl.BlockSpec((tb, 784), lambda i: (i, 0))
    out_spec = pl.BlockSpec((tb, 10), lambda i: (i, 0))

    def resident(shape):
        # Constant block index every grid step -> fetched once, VMEM-resident.
        # Single-buffered: double buffering a never-changing block is wasted VMEM.
        return pl.BlockSpec(shape, lambda i: (0, 0), pipeline_mode=pl.Buffered(1))

    flops = 2 * B * sum(fi * fo for fi, fo in _LAYER_DIMS)
    weight_bytes = sum(fi * fo * 2 + fo * 4 for fi, fo in _LAYER_DIMS)
    cost = pl.CostEstimate(
        flops=flops,
        transcendentals=11 * B,                       # 10 exp + 1 log per row
        bytes_accessed=B * (784 * 4 + 10 * 4) + weight_bytes,
    )

    kernel = pl.pallas_call(
        _mlp_kernel,
        out_shape=jax.ShapeDtypeStruct((B, 10), jnp.float32),
        grid=grid,
        in_specs=[
            x_spec,
            resident((784, 256)), resident((1, 256)),
            resident((256, 128)), resident((1, 128)),
            resident((64, 10)) if False else resident((128, 64)), resident((1, 64)),
            resident((64, 10)),   resident((1, 10)),
        ],
        out_specs=out_spec,
        compiler_params=pltpu.CompilerParams(
            dimension_semantics=("parallel",),        # v7x: shard batch over 2 TCs
            vmem_limit_bytes=48 * 1024 * 1024,        # room for the big x tile
        ),                                            # (safe on v5e/v6e/v7x)
        cost_estimate=cost,
    )
    return kernel(x2d, w1b, b1, w2b, b2, w3b, b3, w4b, b4)


def init_params(key):
    """Deterministic init mimicking nn.Linear's default U(-1/sqrt(fan_in), +)."""
    params = []
    for i, (fan_in, fan_out) in enumerate(_LAYER_DIMS):
        kw, kb = jax.random.split(jax.random.fold_in(key, i))
        bound = 1.0 / jnp.sqrt(jnp.float32(fan_in))
        # Stored as (in, out) so the kernel computes x @ W + b (== x @ W.T + b
        # in PyTorch layout); biases kept 2-D (1, out) for TPU-friendly layout.
        w = jax.random.uniform(kw, (fan_in, fan_out), jnp.float32, -bound, bound)
        b = jax.random.uniform(kb, (1, fan_out), jnp.float32, -bound, bound)
        params.append((w, b))
    return params


def _reference_forward(x, params):
    """Pure-JAX reference using the same bf16-operand / f32-accum arithmetic."""
    B = x.shape[0]
    h = x.reshape(B, -1).astype(jnp.bfloat16)
    (w1, b1), (w2, b2), (w3, b3), (w4, b4) = params

    def layer(h, w, b):
        return jnp.dot(h, w.astype(jnp.bfloat16),
                       preferred_element_type=jnp.float32) + b

    h = jnp.maximum(layer(h, w1, b1), 0.0).astype(jnp.bfloat16)
    h = jnp.maximum(layer(h, w2, b2), 0.0).astype(jnp.bfloat16)
    h = jnp.maximum(layer(h, w3, b3), 0.0).astype(jnp.bfloat16)
    logits = layer(h, w4, b4)
    return jax.nn.log_softmax(logits, axis=1)


if __name__ == "__main__":
    key = jax.random.PRNGKey(0)
    k_x, k_p = jax.random.split(key)
    params = init_params(k_p)

    # Case 1: small MNIST-like batch (B=8, NCHW input), single grid step.
    B = 8
    x = jax.random.normal(k_x, (B, 1, 28, 28), jnp.float32)
    out = jax.block_until_ready(classifier_forward(x, params))
    ref = _reference_forward(x, params)
    assert out.shape == (B, 10)
    assert jnp.allclose(out, ref, atol=5e-3, rtol=5e-3), "mismatch vs reference (B=8)"
    # Sanity: rows are valid log-prob distributions.
    assert jnp.allclose(jnp.sum(jnp.exp(out), axis=1), 1.0, atol=1e-3)

    # Case 2: batch not a multiple of the tile (default tiling) -> ragged
    # final block exercises the partial-block masking path (grid = 2 steps).
    B2 = 20
    x2 = jax.random.normal(jax.random.fold_in(k_x, 1), (B2, 1, 28, 28), jnp.float32)
    out2 = jax.block_until_ready(classifier_forward(x2, params))
    ref2 = _reference_forward(x2, params)
    assert out2.shape == (B2, 10)
    assert jnp.allclose(out2, ref2, atol=5e-3, rtol=5e-3), "mismatch vs reference (B=20)"

    # Case 3: tiny explicit tile -> multi-step grid + ragged last block.
    out3 = jax.block_until_ready(classifier_forward(x2, params, tile_b=8))
    assert jnp.allclose(out3, ref2, atol=5e-3, rtol=5e-3), "mismatch vs reference (B=20, tb=8)"

    print("KERNEL_OK")
</pallas_src>

<mosaic_0001>
module attributes {stable_mosaic.version = 11 : i64} {
  func.func @_mlp_kernel(%arg0: i32, %arg1: memref<8x784xf32, #tpu.memory_space<vmem>>, %arg2: memref<784x256xbf16, #tpu.memory_space<vmem>>, %arg3: memref<1x256xf32, #tpu.memory_space<vmem>>, %arg4: memref<256x128xbf16, #tpu.memory_space<vmem>>, %arg5: memref<1x128xf32, #tpu.memory_space<vmem>>, %arg6: memref<128x64xbf16, #tpu.memory_space<vmem>>, %arg7: memref<1x64xf32, #tpu.memory_space<vmem>>, %arg8: memref<64x10xbf16, #tpu.memory_space<vmem>>, %arg9: memref<1x10xf32, #tpu.memory_space<vmem>>, %arg10: memref<8x10xf32, #tpu.memory_space<vmem>>) attributes {dimension_semantics = [#tpu.dimension_semantics<parallel>], iteration_bounds = array<i64: 1>, scalar_prefetch = 0 : i64, scratch_operands = 0 : i64, tpu.core_type = #tpu.core_type<tc>, window_params = [{transform_indices = @transform_0, window_bounds = array<i64: 8, 784>}, {pipeline_mode = #tpu.pipeline_mode<synchronous>, transform_indices = @transform_1, window_bounds = array<i64: 784, 256>}, {pipeline_mode = #tpu.pipeline_mode<synchronous>, transform_indices = @transform_2, window_bounds = array<i64: 1, 256>}, {pipeline_mode = #tpu.pipeline_mode<synchronous>, transform_indices = @transform_3, window_bounds = array<i64: 256, 128>}, {pipeline_mode = #tpu.pipeline_mode<synchronous>, transform_indices = @transform_4, window_bounds = array<i64: 1, 128>}, {pipeline_mode = #tpu.pipeline_mode<synchronous>, transform_indices = @transform_5, window_bounds = array<i64: 128, 64>}, {pipeline_mode = #tpu.pipeline_mode<synchronous>, transform_indices = @transform_6, window_bounds = array<i64: 1, 64>}, {pipeline_mode = #tpu.pipeline_mode<synchronous>, transform_indices = @transform_7, window_bounds = array<i64: 64, 10>}, {pipeline_mode = #tpu.pipeline_mode<synchronous>, transform_indices = @transform_8, window_bounds = array<i64: 1, 10>}, {transform_indices = @transform_9, window_bounds = array<i64: 8, 10>}]} {
    %c0 = arith.constant 0 : index
    %c0_0 = arith.constant 0 : index
    %0 = vector.load %arg1[%c0, %c0_0] : memref<8x784xf32, #tpu.memory_space<vmem>>, vector<8x784xf32>
    %1 = arith.truncf %0 : vector<8x784xf32> to vector<8x784xbf16>
    %c0_1 = arith.constant 0 : index
    %c0_2 = arith.constant 0 : index
    %2 = vector.load %arg2[%c0_1, %c0_2] : memref<784x256xbf16, #tpu.memory_space<vmem>>, vector<784x256xbf16>
    %cst = arith.constant dense<0.000000e+00> : vector<8x256xf32>
    %3 = tpu.matmul %1, %2, %cst {dimension_numbers = #tpu.dot_dimension_numbers<[1], [0], [0], [1], [0, 0, 1, 1], [], []>} : vector<8x784xbf16>, vector<784x256xbf16>, vector<8x256xf32> -> vector<8x256xf32>
    %c0_3 = arith.constant 0 : index
    %c0_4 = arith.constant 0 : index
    %4 = vector.load %arg3[%c0_3, %c0_4] : memref<1x256xf32, #tpu.memory_space<vmem>>, vector<1x256xf32>
    %5 = vector.broadcast %4 : vector<1x256xf32> to vector<8x256xf32>
    %6 = arith.addf %3, %5 : vector<8x256xf32>
    %cst_5 = arith.constant 0.000000e+00 : f32
    %7 = vector.broadcast %cst_5 : f32 to vector<8x256xf32>
    %8 = arith.maximumf %6, %7 : vector<8x256xf32>
    %9 = arith.truncf %8 : vector<8x256xf32> to vector<8x256xbf16>
    %c0_6 = arith.constant 0 : index
    %c0_7 = arith.constant 0 : index
    %10 = vector.load %arg4[%c0_6, %c0_7] : memref<256x128xbf16, #tpu.memory_space<vmem>>, vector<256x128xbf16>
    %cst_8 = arith.constant dense<0.000000e+00> : vector<8x128xf32>
    %11 = tpu.matmul %9, %10, %cst_8 {dimension_numbers = #tpu.dot_dimension_numbers<[1], [0], [0], [1], [0, 0, 1, 1], [], []>} : vector<8x256xbf16>, vector<256x128xbf16>, vector<8x128xf32> -> vector<8x128xf32>
    %c0_9 = arith.constant 0 : index
    %c0_10 = arith.constant 0 : index
    %12 = vector.load %arg5[%c0_9, %c0_10] : memref<1x128xf32, #tpu.memory_space<vmem>>, vector<1x128xf32>
    %13 = vector.broadcast %12 : vector<1x128xf32> to vector<8x128xf32>
    %14 = arith.addf %11, %13 : vector<8x128xf32>
    %cst_11 = arith.constant 0.000000e+00 : f32
    %15 = vector.broadcast %cst_11 : f32 to vector<8x128xf32>
    %16 = arith.maximumf %14, %15 : vector<8x128xf32>
    %17 = arith.truncf %16 : vector<8x128xf32> to vector<8x128xbf16>
    %c0_12 = arith.constant 0 : index
    %c0_13 = arith.constant 0 : index
    %18 = vector.load %arg6[%c0_12, %c0_13] : memref<128x64xbf16, #tpu.memory_space<vmem>>, vector<128x64xbf16>
    %cst_14 = arith.constant dense<0.000000e+00> : vector<8x64xf32>
    %19 = tpu.matmul %17, %18, %cst_14 {dimension_numbers = #tpu.dot_dimension_numbers<[1], [0], [0], [1], [0, 0, 1, 1], [], []>} : vector<8x128xbf16>, vector<128x64xbf16>, vector<8x64xf32> -> vector<8x64xf32>
    %c0_15 = arith.constant 0 : index
    %c0_16 = arith.constant 0 : index
    %20 = vector.load %arg7[%c0_15, %c0_16] : memref<1x64xf32, #tpu.memory_space<vmem>>, vector<1x64xf32>
    %21 = vector.broadcast %20 : vector<1x64xf32> to vector<8x64xf32>
    %22 = arith.addf %19, %21 : vector<8x64xf32>
    %cst_17 = arith.constant 0.000000e+00 : f32
    %23 = vector.broadcast %cst_17 : f32 to vector<8x64xf32>
    %24 = arith.maximumf %22, %23 : vector<8x64xf32>
    %25 = arith.truncf %24 : vector<8x64xf32> to vector<8x64xbf16>
    %c0_18 = arith.constant 0 : index
    %c0_19 = arith.constant 0 : index
    %26 = vector.load %arg8[%c0_18, %c0_19] : memref<64x10xbf16, #tpu.memory_space<vmem>>, vector<64x10xbf16>
    %cst_20 = arith.constant dense<0.000000e+00> : vector<8x10xf32>
    %27 = tpu.matmul %25, %26, %cst_20 {dimension_numbers = #tpu.dot_dimension_numbers<[1], [0], [0], [1], [0, 0, 1, 1], [], []>} : vector<8x64xbf16>, vector<64x10xbf16>, vector<8x10xf32> -> vector<8x10xf32>
    %c0_21 = arith.constant 0 : index
    %c0_22 = arith.constant 0 : index
    %28 = vector.load %arg9[%c0_21, %c0_22] : memref<1x10xf32, #tpu.memory_space<vmem>>, vector<1x10xf32>
    %29 = vector.broadcast %28 : vector<1x10xf32> to vector<8x10xf32>
    %30 = arith.addf %27, %29 : vector<8x10xf32>
    %cst_23 = arith.constant dense<0xFF800000> : vector<8xf32>
    %31 = vector.multi_reduction <maximumf>, %30, %cst_23 [1] : vector<8x10xf32> to vector<8xf32>
    %32 = vector.shape_cast %31 : vector<8xf32> to vector<8x1xf32>
    %33 = vector.broadcast %32 : vector<8x1xf32> to vector<8x10xf32>
    %34 = arith.subf %30, %33 : vector<8x10xf32>
    %35 = math.exp %34 : vector<8x10xf32>
    %cst_24 = arith.constant dense<0.000000e+00> : vector<8xf32>
    %36 = vector.multi_reduction <add>, %35, %cst_24 [1] : vector<8x10xf32> to vector<8xf32>
    %37 = vector.shape_cast %36 : vector<8xf32> to vector<8x1xf32>
    %38 = math.log %37 : vector<8x1xf32>
    %39 = vector.broadcast %38 : vector<8x1xf32> to vector<8x10xf32>
    %40 = arith.subf %34, %39 : vector<8x10xf32>
    %c0_25 = arith.constant 0 : index
    %c0_26 = arith.constant 0 : index
    %41 = vector.load %arg10[%c0_25, %c0_26] : memref<8x10xf32, #tpu.memory_space<vmem>>, vector<8x10xf32>
    tpu.vector_store %arg10[%c0_25, %c0_26], %40 {strides = array<i32>} : memref<8x10xf32, #tpu.memory_space<vmem>>, vector<8x10xf32>,
    return
  }
  func.func @transform_0(%arg0: i32) -> (i32, i32) {
    %c0_i32 = arith.constant 0 : i32
    %c0_i32_0 = arith.constant 0 : i32
    return %arg0, %c0_i32 : i32, i32
  }
  func.func @transform_1(%arg0: i32) -> (i32, i32) {
    %c0_i32 = arith.constant 0 : i32
    %c0_i32_0 = arith.constant 0 : i32
    %c0_i32_1 = arith.constant 0 : i32
    return %c0_i32, %c0_i32_0 : i32, i32
  }
  func.func @transform_2(%arg0: i32) -> (i32, i32) {
    %c0_i32 = arith.constant 0 : i32
    %c0_i32_0 = arith.constant 0 : i32
    %c0_i32_1 = arith.constant 0 : i32
    return %c0_i32, %c0_i32_0 : i32, i32
  }
  func.func @transform_3(%arg0: i32) -> (i32, i32) {
    %c0_i32 = arith.constant 0 : i32
    %c0_i32_0 = arith.constant 0 : i32
    %c0_i32_1 = arith.constant 0 : i32
    return %c0_i32, %c0_i32_0 : i32, i32
  }
  func.func @transform_4(%arg0: i32) -> (i32, i32) {
    %c0_i32 = arith.constant 0 : i32
    %c0_i32_0 = arith.constant 0 : i32
    %c0_i32_1 = arith.constant 0 : i32
    return %c0_i32, %c0_i32_0 : i32, i32
  }
  func.func @transform_5(%arg0: i32) -> (i32, i32) {
    %c0_i32 = arith.constant 0 : i32
    %c0_i32_0 = arith.constant 0 : i32
    %c0_i32_1 = arith.constant 0 : i32
    return %c0_i32, %c0_i32_0 : i32, i32
  }
  func.func @transform_6(%arg0: i32) -> (i32, i32) {
    %c0_i32 = arith.constant 0 : i32
    %c0_i32_0 = arith.constant 0 : i32
    %c0_i32_1 = arith.constant 0 : i32
    return %c0_i32, %c0_i32_0 : i32, i32
  }
  func.func @transform_7(%arg0: i32) -> (i32, i32) {
    %c0_i32 = arith.constant 0 : i32
    %c0_i32_0 = arith.constant 0 : i32
    %c0_i32_1 = arith.constant 0 : i32
    return %c0_i32, %c0_i32_0 : i32, i32
  }
  func.func @transform_8(%arg0: i32) -> (i32, i32) {
    %c0_i32 = arith.constant 0 : i32
    %c0_i32_0 = arith.constant 0 : i32
    %c0_i32_1 = arith.constant 0 : i32
    return %c0_i32, %c0_i32_0 : i32, i32
  }
  func.func @transform_9(%arg0: i32) -> (i32, i32) {
    %c0_i32 = arith.constant 0 : i32
    %c0_i32_0 = arith.constant 0 : i32
    return %arg0, %c0_i32 : i32, i32
  }
}

</mosaic_0001>

<bundles_post_ra>
// kernel: tpu_custom_call.1
= control target key start
LH: loop header
LB: loop body
LE: loop exit
PB: predicated region body
PF: predicated region fallthrough
CT: control target
= control target key end

     0   :  { %14 = vsyncpa [#allocation3], 0  ;;  %s1933_s0 = inlined_call_operand.hbm [shape: f32[8,784], index: 0, kind: input, shape index: {}]   ;;  %s1934_s1 = inlined_call_operand.hbm [shape: bf16[784,256], index: 1, kind: input, shape index: {}]   ;;  %s1935_s2 = inlined_call_operand.vmem [shape: f32[1,256], index: 2, kind: input, shape index: {}]   ;;  %s1936_s3 = inlined_call_operand.vmem [shape: bf16[256,128], index: 3, kind: input, shape index: {}]   ;;  %s1937_s4 = inlined_call_operand.vmem [shape: f32[1,128], index: 4, kind: input, shape index: {}]   ;;  %s1938_s5 = inlined_call_operand.vmem [shape: bf16[128,64], index: 5, kind: input, shape index: {}]   ;;  %s1939_s6 = inlined_call_operand.vmem [shape: f32[1,64], index: 6, kind: input, shape index: {}]   ;;  %s1940_s7 = inlined_call_operand.vmem [shape: bf16[64,10], index: 7, kind: input, shape index: {}]   ;;  %s1941_s8 = inlined_call_operand.vmem [shape: f32[1,10], index: 8, kind: input, shape index: {}]   ;;  %s1942_s9 = inlined_call_operand.hbm [shape: f32[8,10], index: 9, kind: output, shape index: {}]  }
   0x1   :  { %15 = vsyncpa [#allocation6], 0 }
   0x2   :  { %16 = vsyncpa [#allocation4], 0  ;;  %s1719_s30 = smov [#allocation2]   ;;  %s1720_s11 = smov [#allocation5]  }
   0x3   :  { %s23_s10 = sshll.u32 %s1719_s30, 4  ;;  %s32_s12 = sshll.u32 %s1720_s11, 4  ;;  %s24_s10 = int_to_ptr.vmem [resolvable:$true] %s23_s10  ;;  %s1777_s12 = int_to_ptr.vmem [resolvable:$true] %s32_s12 }
   0x4   :  { %s1647_s15 = scalar_lea.hbm %s1933_s0, 896 }
   0x5   :  { %p1648_p0 = scmp.ne.s32.totalorder %s1933_s0, %s1647_s15  ;;  %p1651_p1 = scmp.lt.u32.totalorder %s1647_s15, %s1933_s0 }
   0x7   :  { %p1653_p2 = pnand %p1651_p1, %p1648_p0 }
   0x9   :  { %1656 = shalt.err (!%p1653_p2)
}
   0xa   :  { %s1657_s20 = scalar_lea.vmem %s24_s10, 896  ;;  %p1662_p4 = scmp.lt.s32.totalorder %s24_s10, %s24_s10 }
   0xb   :  { %p1658_p3 = scmp.ne.s32.totalorder %s24_s10, %s1657_s20  ;;  %p1663_p5 = scmp.lt.s32.totalorder %s1657_s20, %s1657_s20 }
   0xd   :  { %p1664_p6 = por %p1663_p5, %p1662_p4 }
   0xf   :  { %p1665_p7 = pnand %p1664_p6, %p1658_p3 }
  0x11   :  { %1668 = shalt.err (!%p1665_p7)
}
  0x12   :  { %26 = dma.hbm_to_vmem [thread:$0]  %s1933_s0, 896, %s24_s10, [#allocation3]  }
  0x13   :  { %s1669_s25 = scalar_lea.hbm %s1934_s1, 12544 }
  0x14   :  { %p1670_p8 = scmp.ne.s32.totalorder %s1934_s1, %s1669_s25  ;;  %p1673_p9 = scmp.lt.u32.totalorder %s1669_s25, %s1934_s1 }
  0x16   :  { %p1675_p10 = pnand %p1673_p9, %p1670_p8 }
  0x18   :  { %1678 = shalt.err (!%p1675_p10)
}
  0x19   :  { %s1679_s30 = scalar_lea.vmem %s1777_s12, 12544  ;;  %p1684_p12 = scmp.lt.s32.totalorder %s1777_s12, %s1777_s12 }
  0x1a   :  { %p1680_p11 = scmp.ne.s32.totalorder %s1777_s12, %s1679_s30  ;;  %p1685_p13 = scmp.lt.s32.totalorder %s1679_s30, %s1679_s30 }
  0x1c   :  { %p1686_p0 = por %p1685_p13, %p1684_p12 }
  0x1e   :  { %p1687_p1 = pnand %p1686_p0, %p1680_p11 }
  0x20   :  { %1690 = shalt.err (!%p1687_p1)
}
  0x21   :  { %s1721_s0 = smov 128   ;;  %s1722_s10 = smov 8  }
  0x22   :  { %38 = dma.hbm_to_vmem [thread:$0]  %s1934_s1, 12544, %s1777_s12, [#allocation6], %s1721_s0, %s1721_s0, %s1722_s10  }
  0x23   :  { %1713 = dma.done.wait [#allocation3], 896  }
  0x24   :  { %1714 = vsyncadd [#allocation3], 4294966400 }
  0x25   :  { %1715 = dma.done.wait [#allocation6], 12544  }
  0x26   :  { %1716 = vsyncadd [#allocation6], 4294954752  ;;  %v1468_v0 = vld [vmem:[#allocation5 + $0x104] ss:$8 sps:$4 sm:$0xff]   ;;  %v1470_v1 = vld [vmem:[#allocation5 + $0x100] ss:$8 sps:$4 sm:$0xff]  }
  0x27   :  { %719 = vmatprep.subr.bf16.mxu0 %v1468_v0  ;;  %v1471_v2 = vld [vmem:[#allocation5 + $0x114] ss:$8 sps:$4 sm:$0xff]   ;;  %v1473_v3 = vld [vmem:[#allocation5 + $0x110] ss:$8 sps:$4 sm:$0xff]   ;;  %v1474_v4 = vld [vmem:[#allocation5 + $0x124] ss:$8 sps:$4 sm:$0xff]  }
  0x28   :  { %720 = vmatpush1.bf16.msra.mxu0 %v1470_v1  ;;  %v1476_v5 = vld [vmem:[#allocation5 + $0x120] ss:$8 sps:$4 sm:$0xff]   ;;  %v1477_v6 = vld [vmem:[#allocation5 + $0x134] ss:$8 sps:$4 sm:$0xff]   ;;  %v1479_v7 = vld [vmem:[#allocation5 + $0x130] ss:$8 sps:$4 sm:$0xff]  }
  0x29   :  { %721 = vmatprep.subr.bf16.mxu0 %v1471_v2  ;;  %v1480_v8 = vld [vmem:[#allocation5 + $0x144] ss:$8 sps:$4 sm:$0xff]   ;;  %v1482_v9 = vld [vmem:[#allocation5 + $0x140] ss:$8 sps:$4 sm:$0xff]   ;;  %v1483_v10 = vld [vmem:[#allocation5 + $0x154] ss:$8 sps:$4 sm:$0xff]  }
  0x2a   :  { %v1485_v11 = vld [vmem:[#allocation5 + $0x150] ss:$8 sps:$4 sm:$0xff]   ;;  %v1486_v12 = vld [vmem:[#allocation5 + $0x164] ss:$8 sps:$4 sm:$0xff]   ;;  %v1488_v15 = vld [vmem:[#allocation5 + $0x160] ss:$8 sps:$4 sm:$0xff]  }
  0x2b   :  { %v63_v13 = vld [vmem:[#allocation2 + $0x18] sm:$0xff]  ;;  %v1489_v16 = vld [vmem:[#allocation5 + $0x174] ss:$8 sps:$4 sm:$0xff]   ;;  %v1491_v18 = vld [vmem:[#allocation5 + $0x170] ss:$8 sps:$4 sm:$0xff]   ;;  %vm674_vm0 = vcmask 130048  }
  0x2c   :  { %722 = vmatpush1.bf16.msra.mxu0 %v1473_v3  ;;  %v70_v14 = vpack.c.bf16 %v63_v13, %v63_v13  ;;  %v1522_v17 = vld [vmem:[#allocation5 + $0x4] ss:$8 sps:$4 sm:$0xff]   ;;  %v1527_v20 = vld [vmem:[#allocation5] ss:$8 sps:$4 sm:$0xff]   ;;  %v1528_v21 = vld [vmem:[#allocation5 + $0x14] ss:$8 sps:$4 sm:$0xff]  }
  0x2d   :  { %723 = vmatprep.subr.bf16.mxu0 %v1474_v4  ;;  %v1492_v19 = vld [vmem:[#allocation5 + $0x184] ss:$8 sps:$4 sm:$0xff]   ;;  %678 = vmatprep.subr.bf16.mxu1 %v1522_v17  ;;  %v1533_v22 = vld [vmem:[#allocation5 + $0x10] ss:$8 sps:$4 sm:$0xff]   ;;  %v1494_v24 = vld [vmem:[#allocation5 + $0x180] ss:$8 sps:$4 sm:$0xff]  }
  0x2e   :  { %751 = vmatprep.mubr.bf16.mxu0 %v70_v14  ;;  %679 = vmatpush1.bf16.msra.mxu1 %v1527_v20  ;;  %v1534_v23 = vld [vmem:[#allocation5 + $0x24] ss:$8 sps:$4 sm:$0xff]   ;;  %v1495_v25 = vld [vmem:[#allocation5 + $0x194] ss:$8 sps:$4 sm:$0xff]   ;;  %v1539_v26 = vld [vmem:[#allocation5 + $0x20] ss:$8 sps:$4 sm:$0xff]  }
  0x2f   :  { %680 = vmatprep.subr.bf16.mxu1 %v1528_v21  ;;  %v1540_v27 = vld [vmem:[#allocation5 + $0x34] ss:$8 sps:$4 sm:$0xff]   ;;  %v1497_v28 = vld [vmem:[#allocation5 + $0x190] ss:$8 sps:$4 sm:$0xff]   ;;  %v1498_v29 = vld [vmem:[#allocation5 + $0x1a4] ss:$8 sps:$4 sm:$0xff]  }
  0x30   :  { %724 = vmatpush1.bf16.msra.mxu0 %v1476_v5  ;;  %v1545_v30 = vld [vmem:[#allocation5 + $0x30] ss:$8 sps:$4 sm:$0xff]   ;;  %v1546_v31 = vld [vmem:[#allocation5 + $0x44] ss:$8 sps:$4 sm:$0xff]   ;;  %v1500_v32 = vld [vmem:[#allocation5 + $0x1a0] ss:$8 sps:$4 sm:$0xff]  }
  0x31   :  { %725 = vmatprep.subr.bf16.mxu0 %v1477_v6  ;;  %v1501_v33 = vld [vmem:[#allocation5 + $0x1b4] ss:$8 sps:$4 sm:$0xff]   ;;  %v1551_v34 = vld [vmem:[#allocation5 + $0x40] ss:$8 sps:$4 sm:$0xff]   ;;  %v1503_v36 = vld [vmem:[#allocation5 + $0x1b0] ss:$8 sps:$4 sm:$0xff]  }
  0x32   :  { %681 = vmatpush1.bf16.msra.mxu1 %v1533_v22  ;;  %v1552_v35 = vld [vmem:[#allocation5 + $0x54] ss:$8 sps:$4 sm:$0xff]   ;;  %v1504_v37 = vld [vmem:[#allocation5 + $0x1c4] ss:$8 sps:$4 sm:$0xff]   ;;  %v1557_v38 = vld [vmem:[#allocation5 + $0x50] ss:$8 sps:$4 sm:$0xff]  }
  0x33   :  { %682 = vmatprep.subr.bf16.mxu1 %v1534_v23  ;;  %v1558_v39 = vld [vmem:[#allocation5 + $0x64] ss:$8 sps:$4 sm:$0xff]   ;;  %v1506_v40 = vld [vmem:[#allocation5 + $0x1c0] ss:$8 sps:$4 sm:$0xff]   ;;  %v1507_v41 = vld [vmem:[#allocation5 + $0x1d4] ss:$8 sps:$4 sm:$0xff]  }
  0x34   :  { %726 = vmatpush1.bf16.msra.mxu0 %v1479_v7  ;;  %v1563_v42 = vld [vmem:[#allocation5 + $0x60] ss:$8 sps:$4 sm:$0xff]   ;;  %v1564_v43 = vld [vmem:[#allocation5 + $0x74] ss:$8 sps:$4 sm:$0xff]   ;;  %v1509_v44 = vld [vmem:[#allocation5 + $0x1d0] ss:$8 sps:$4 sm:$0xff]  }
  0x35   :  { %727 = vmatprep.subr.bf16.mxu0 %v1480_v8  ;;  %v1510_v45 = vld [vmem:[#allocation5 + $0x1e4] ss:$8 sps:$4 sm:$0xff]   ;;  %v1569_v46 = vld [vmem:[#allocation5 + $0x70] ss:$8 sps:$4 sm:$0xff]   ;;  %v1512_v48 = vld [vmem:[#allocation5 + $0x1e0] ss:$8 sps:$4 sm:$0xff]  }
  0x36   :  { %683 = vmatpush1.bf16.msra.mxu1 %v1539_v26  ;;  %v1570_v47 = vld [vmem:[#allocation5 + $0x84] ss:$8 sps:$4 sm:$0xff]   ;;  %v1513_v49 = vld [vmem:[#allocation5 + $0x1f4] ss:$8 sps:$4 sm:$0xff]   ;;  %v1575_v50 = vld [vmem:[#allocation5 + $0x80] ss:$8 sps:$4 sm:$0xff]  }
  0x37   :  { %684 = vmatprep.subr.bf16.mxu1 %v1540_v27  ;;  %v1515_v51 = vld [vmem:[#allocation5 + $0x1f0] ss:$8 sps:$4 sm:$0xff]   ;;  %v1576_v52 = vld [vmem:[#allocation5 + $0x94] ss:$8 sps:$4 sm:$0xff]   ;;  %v1518_v54 = vld [vmem:[#allocation5 + $0x204] ss:$8 sps:$4 sm:$0xff]  }
  0x38   :  { %728 = vmatpush1.bf16.msra.mxu0 %v1482_v9  ;;  %v62_v53 = vld [vmem:[#allocation2 + $0x10] sm:$0xff]  ;;  %v1582_v56 = vld [vmem:[#allocation5 + $0xa4] ss:$8 sps:$4 sm:$0xff]   ;;  %v65_v58 = vld [vmem:[#allocation2 + $0x28] sm:$0xff]  ;;  %vm1725_vm1 = vmmov 0   ;;  %vm1175_vm2 = vcmask 523264  }
  0x39   :  { %729 = vmatprep.subr.bf16.mxu0 %v1483_v10  ;;  %v1581_v55 = vld [vmem:[#allocation5 + $0x90] ss:$8 sps:$4 sm:$0xff]   ;;  %v69_v57 = vpack.c.bf16 %v62_v53, %v62_v53  ;;  %v1516_v59 = vld [vmem:[#allocation5 + $0x200] ss:$8 sps:$4 sm:$0xff]   ;;  %v72_v60 = vpack.c.bf16 %v65_v58, %v65_v58  ;;  %v1521_v61 = vld [vmem:[#allocation5 + $0x214] ss:$8 sps:$4 sm:$0xff]  }
  0x3a   :  { %685 = vmatpush1.bf16.msra.mxu1 %v1545_v30  ;;  %v1587_v62 = vld [vmem:[#allocation5 + $0xa0] ss:$8 sps:$4 sm:$0xff]   ;;  %v1588_v63 = vld [vmem:[#allocation5 + $0xb4] ss:$8 sps:$4 sm:$0xff]   ;;  %v1519_v1 = vld [vmem:[#allocation5 + $0x210] ss:$8 sps:$4 sm:$0xff]  }
  0x3b   :  { %686 = vmatprep.subr.bf16.mxu1 %v1546_v31  ;;  %v61_v0 = vld [vmem:[#allocation2 + $0x8] sm:$0xff]  ;;  %v1526_v3 = vld [vmem:[#allocation5 + $0x224] ss:$8 sps:$4 sm:$0xff]   ;;  %v1524_v6 = vld [vmem:[#allocation5 + $0x220] ss:$8 sps:$4 sm:$0xff]   ;;  %vm1219_vm3 = vcmask 80896  }
  0x3c   :  { %730 = vmatpush1.bf16.msra.mxu0 %v1485_v11  ;;  %v68_v2 = vpack.c.bf16 %v61_v0, %v61_v0  ;;  %v1593_v4 = vld [vmem:[#allocation5 + $0xb0] ss:$8 sps:$4 sm:$0xff]   ;;  %v1594_v5 = vld [vmem:[#allocation5 + $0xc4] ss:$8 sps:$4 sm:$0xff]   ;;  %v1532_v7 = vld [vmem:[#allocation5 + $0x234] ss:$8 sps:$4 sm:$0xff]  }
  0x3d   :  { %731 = vmatprep.subr.bf16.mxu0 %v1486_v12  ;;  %v1599_v8 = vld [vmem:[#allocation5 + $0xc0] ss:$8 sps:$4 sm:$0xff]   ;;  %v1600_v9 = vld [vmem:[#allocation5 + $0xd4] ss:$8 sps:$4 sm:$0xff]   ;;  %v1530_v10 = vld [vmem:[#allocation5 + $0x230] ss:$8 sps:$4 sm:$0xff]  }
  0x3e   :  { %687 = vmatpush1.bf16.msra.mxu1 %v1551_v34  ;;  %710 = vmatprep.mubr.bf16.mxu1 %v68_v2  ;;  %v1538_v11 = vld [vmem:[#allocation5 + $0x244] ss:$8 sps:$4 sm:$0xff]   ;;  %v1536_v12 = vld [vmem:[#allocation5 + $0x240] ss:$8 sps:$4 sm:$0xff]   ;;  %v1605_v13 = vld [vmem:[#allocation5 + $0xd0] ss:$8 sps:$4 sm:$0xff]  }
  0x3f   :  { %688 = vmatprep.subr.bf16.mxu1 %v1552_v35  ;;  %v1606_v14 = vld [vmem:[#allocation5 + $0xe4] ss:$8 sps:$4 sm:$0xff]   ;;  %v1612_v17 = vld [vmem:[#allocation5 + $0xf4] ss:$8 sps:$4 sm:$0xff]   ;;  %v1614_v20 = vld [vmem:[#allocation5 + $0xf0] ss:$8 sps:$4 sm:$0xff]  }
  0x40   :  { %732 = vmatpush1.bf16.msra.mxu0 %v1488_v15  ;;  %v1544_v15 = vld [vmem:[#allocation5 + $0x254] ss:$8 sps:$4 sm:$0xff]   ;;  %v60_v21 = vld [vmem:[#allocation2] sm:$0xff]  ;;  %v1621_v35 = vld [vmem:[%s1936_s3 + $0x58] sm:$0xff]  }
  0x41   :  { %733 = vmatprep.subr.bf16.mxu0 %v1489_v16  ;;  %v1611_v16 = vld [vmem:[#allocation5 + $0xe0] ss:$8 sps:$4 sm:$0xff]   ;;  %v67_v26 = vpack.c.bf16 %v60_v21, %v60_v21  ;;  %v1617_v27 = vld [vmem:[%s1936_s3 + $0x48] sm:$0xff]   ;;  %v1619_v31 = vld [vmem:[%s1936_s3 + $0x50] sm:$0xff]  }
  0x42   :  { %689 = vmatpush1.bf16.msra.mxu1 %v1557_v38  ;;  %v1615_v22 = vld [vmem:[%s1936_s3 + $0x40] sm:$0xff]   ;;  %v1618_v30 = vld [vmem:[%s1936_s3 + $0x8] sm:$0xff]   ;;  %v1620_v34 = vld [vmem:[%s1936_s3 + $0x10] sm:$0xff]  }
  0x43   :  { %690 = vmatprep.subr.bf16.mxu1 %v1558_v39  ;;  %v1548_v23 = vld [vmem:[#allocation5 + $0x260] ss:$8 sps:$4 sm:$0xff]   ;;  %v1610_v53 = vld [vmem:[#allocation5 + $0x304] ss:$8 sps:$4 sm:$0xff]  }
  0x44   :  { %734 = vmatpush1.bf16.msra.mxu0 %v1491_v18  ;;  %v1542_v18 = vld [vmem:[#allocation5 + $0x250] ss:$8 sps:$4 sm:$0xff]   ;;  %v1622_v38 = vld [vmem:[%s1936_s3 + $0x18] sm:$0xff]   ;;  %v1623_v39 = vld [vmem:[%s1936_s3 + $0x60] sm:$0xff]  }
  0x45   :  { %735 = vmatprep.subr.bf16.mxu0 %v1492_v19  ;;  %v1550_v19 = vld [vmem:[#allocation5 + $0x264] ss:$8 sps:$4 sm:$0xff]  }
  0x46   :  { %691 = vmatpush1.bf16.msra.mxu1 %v1563_v42  ;;  %v1624_v42 = vld [vmem:[%s1936_s3 + $0x20] sm:$0xff]   ;;  %v1630_v0 = vld [vmem:[%s1936_s3 + $0x38] sm:$0xff]  }
  0x47   :  { %692 = vmatprep.subr.bf16.mxu1 %v1564_v43  ;;  %v1578_v43 = vld [vmem:[#allocation5 + $0x2b0] ss:$8 sps:$4 sm:$0xff]  }
  0x48   :  { %736 = vmatpush1.bf16.msra.mxu0 %v1494_v24  ;;  %v1556_v24 = vld [vmem:[#allocation5 + $0x274] ss:$8 sps:$4 sm:$0xff]  }
  0x49   :  { %737 = vmatprep.subr.bf16.mxu0 %v1495_v25  ;;  %v1616_v25 = vld [vmem:[%s1936_s3] sm:$0xff]  }
  0x4a   :  { %693 = vmatpush1.bf16.msra.mxu1 %v1569_v46  ;;  %v1592_v46 = vld [vmem:[#allocation5 + $0x2d4] ss:$8 sps:$4 sm:$0xff]  }
  0x4b   :  { %694 = vmatprep.subr.bf16.mxu1 %v1570_v47  ;;  %v1590_v47 = vld [vmem:[#allocation5 + $0x2d0] ss:$8 sps:$4 sm:$0xff]  }
  0x4c   :  { %738 = vmatpush1.bf16.msra.mxu0 %v1497_v28  ;;  %v1554_v28 = vld [vmem:[#allocation5 + $0x270] ss:$8 sps:$4 sm:$0xff]  }
  0x4d   :  { %739 = vmatprep.subr.bf16.mxu0 %v1498_v29  ;;  %v1562_v29 = vld [vmem:[#allocation5 + $0x284] ss:$8 sps:$4 sm:$0xff]  }
  0x4e   :  { %695 = vmatpush1.bf16.msra.mxu1 %v1575_v50  ;;  %v1604_v50 = vld [vmem:[#allocation5 + $0x2f4] ss:$8 sps:$4 sm:$0xff]  }
  0x4f   :  { %696 = vmatprep.subr.bf16.mxu1 %v1576_v52  ;;  %v64_v52 = vld [vmem:[#allocation2 + $0x20] sm:$0xff] }
  0x50   :  { %740 = vmatpush1.bf16.msra.mxu0 %v1500_v32  ;;  %v1560_v32 = vld [vmem:[#allocation5 + $0x280] ss:$8 sps:$4 sm:$0xff]  }
  0x51   :  { %741 = vmatprep.subr.bf16.mxu0 %v1501_v33  ;;  %v1568_v33 = vld [vmem:[#allocation5 + $0x294] ss:$8 sps:$4 sm:$0xff]  }
  0x52   :  { %697 = vmatpush1.bf16.msra.mxu1 %v1581_v55  ;;  %v1608_v55 = vld [vmem:[#allocation5 + $0x300] ss:$8 sps:$4 sm:$0xff]  }
  0x53   :  { %698 = vmatprep.subr.bf16.mxu1 %v1582_v56  ;;  %v1723_v56 = vmov 0  }
  0x54   :  { %742 = vmatpush1.bf16.msra.mxu0 %v1503_v36  ;;  %v1566_v36 = vld [vmem:[#allocation5 + $0x290] ss:$8 sps:$4 sm:$0xff]  }
  0x55   :  { %743 = vmatprep.subr.bf16.mxu0 %v1504_v37  ;;  %v1574_v37 = vld [vmem:[#allocation5 + $0x2a4] ss:$8 sps:$4 sm:$0xff]  }
  0x56   :  { %699 = vmatpush1.bf16.msra.mxu1 %v1587_v62  ;;  %v1628_v62 = vld [vmem:[%s1936_s3 + $0x30] sm:$0xff]  }
  0x57   :  { %700 = vmatprep.subr.bf16.mxu1 %v1588_v63  ;;  %v1629_v63 = vld [vmem:[%s1936_s3 + $0x78] sm:$0xff]  }
  0x58   :  { %744 = vmatpush1.bf16.msra.mxu0 %v1506_v40  ;;  %v1572_v40 = vld [vmem:[#allocation5 + $0x2a0] ss:$8 sps:$4 sm:$0xff]  }
  0x59   :  { %745 = vmatprep.subr.bf16.mxu0 %v1507_v41  ;;  %v1580_v41 = vld [vmem:[#allocation5 + $0x2b4] ss:$8 sps:$4 sm:$0xff]  }
  0x5a   :  { %701 = vmatpush1.bf16.msra.mxu1 %v1593_v4 }
  0x5b   :  { %702 = vmatprep.subr.bf16.mxu1 %v1594_v5 }
  0x5c   :  { %746 = vmatpush1.bf16.msra.mxu0 %v1509_v44  ;;  %v1586_v44 = vld [vmem:[#allocation5 + $0x2c4] ss:$8 sps:$4 sm:$0xff]  }
  0x5d   :  { %747 = vmatprep.subr.bf16.mxu0 %v1510_v45  ;;  %v1584_v45 = vld [vmem:[#allocation5 + $0x2c0] ss:$8 sps:$4 sm:$0xff]  }
  0x5e   :  { %703 = vmatpush1.bf16.msra.mxu1 %v1599_v8 }
  0x5f   :  { %704 = vmatprep.subr.bf16.mxu1 %v1600_v9  ;;  %v172_v9 = vld [vmem:[%s1935_s2] sm:$0x3] }
  0x60   :  { %748 = vmatpush1.bf16.msra.mxu0 %v1512_v48  ;;  %v1598_v48 = vld [vmem:[#allocation5 + $0x2e4] ss:$8 sps:$4 sm:$0xff]  }
  0x61   :  { %749 = vmatprep.subr.bf16.mxu0 %v1513_v49  ;;  %v1596_v49 = vld [vmem:[#allocation5 + $0x2e0] ss:$8 sps:$4 sm:$0xff]  }
  0x62   :  { %705 = vmatpush1.bf16.msra.mxu1 %v1605_v13 }
  0x63   :  { %706 = vmatprep.subr.bf16.mxu1 %v1606_v14 }
  0x64   :  { %750 = vmatpush1.bf16.msra.mxu0 %v1515_v51  ;;  %v1602_v51 = vld [vmem:[#allocation5 + $0x2f0] ss:$8 sps:$4 sm:$0xff]  }
  0x65   :  { %760 = vmatprep.subr.bf16.mxu0 %v1518_v54  ;;  %v71_v54 = vpack.c.bf16 %v64_v52, %v64_v52 }
  0x66   :  { %707 = vmatpush1.bf16.msra.mxu1 %v1611_v16 }
  0x67   :  { %752 = vmatmul.mubr.bf16.vlgmr.msra.gmra.mrb[0].mxu0 %v69_v57  ;;  %708 = vmatprep.subr.bf16.mxu1 %v1612_v17  ;;  %v66_v57 = vld [vmem:[#allocation2 + $0x30] sm:$0xff] }
  0x68   :  { %761 = vmatpush1.bf16.msra.mxu0 %v1516_v59  ;;  %792 = vmatprep.mubr.bf16.mxu0 %v72_v60  ;;  %v73_v58 = vpack.c.bf16 %v66_v57, %v66_v57  ;;  %v1625_v59 = vld [vmem:[%s1936_s3 + $0x68] sm:$0xff]  }
  0x69   :  { %762 = vmatprep.subr.bf16.mxu0 %v1521_v61  ;;  %v1626_v60 = vld [vmem:[%s1936_s3 + $0x28] sm:$0xff]   ;;  %v1627_v61 = vld [vmem:[%s1936_s3 + $0x70] sm:$0xff]  }
  0x6a   :  { %709 = vmatpush1.bf16.msra.mxu1 %v1614_v20 }
  0x6b   :  { %1380 = vmatprep.subr.bf16.mxu1 %v1615_v22 }
  0x6c   :  { %763 = vmatpush1.bf16.msra.mxu0 %v1519_v1  ;;  %v1724_v1 = vmov 0.0  }
  0x6d   :  { %764 = vmatprep.subr.bf16.mxu0 %v1526_v3  ;;  %711 = vmatmul.mubr.bf16.vlgmr.msra.gmra.mrb[0].mxu1 %v67_v26  ;;  %v1632_v26 = vld [vmem:[%s1938_s5 + $0x8] sm:$0xff]  }
  0x6e   :  { %1381 = vmatpush3.bf16.msra.mxu1 %v1616_v25 }
  0x6f   :  { %1382 = vmatprep.subr.bf16.mxu1 %v1617_v27  ;;  %v1633_v27 = vld [vmem:[%s1938_s5 + $0x10] sm:$0xff]  }
  0x70   :  { %765 = vmatpush1.bf16.msra.mxu0 %v1524_v6  ;;  %v174_v6 = vlaneseq }
  0x71   :  { %766 = vmatprep.subr.bf16.mxu0 %v1532_v7 }
  0x72   :  { %1383 = vmatpush3.bf16.msra.mxu1 %v1618_v30  ;;  %v175_v7 = vshrl.u32 %v174_v6, 7  ;;  %v1636_v30 = vld [vmem:[%s1938_s5 + $0x28] sm:$0xff]  }
  0x73   :  { %1384 = vmatprep.subr.bf16.mxu1 %v1619_v31  ;;  %v1637_v31 = vld [vmem:[%s1938_s5 + $0x30] sm:$0xff]  }
  0x74   :  { %767 = vmatpush1.bf16.msra.mxu0 %v1530_v10  ;;  %v176_v8 = vsub.s32 0, %v175_v7  ;;  %v180_v10 = vsub.s32 1, %v175_v7 }
  0x75   :  { %768 = vmatprep.subr.bf16.mxu0 %v1538_v11 }
  0x76   :  { %1385 = vmatpush3.bf16.msra.mxu1 %v1620_v34  ;;  %v177_v11 = vrot.slane %v172_v9, %v176_v8  ;;  %v1348_v34 = vld [vmem:[%s1937_s4] ss:$0 sm:$0xff] }
  0x77   :  { %1386 = vmatprep.subr.bf16.mxu1 %v1621_v35 }
  0x78   :  { %769 = vmatpush1.bf16.msra.mxu0 %v1536_v12  ;;  %v181_v12 = vrot.slane %v172_v9, %v180_v10 }
  0x79   :  { %770 = vmatprep.subr.bf16.mxu0 %v1544_v15 }
  0x7a   :  { %1387 = vmatpush3.bf16.msra.mxu1 %v1622_v38 }
  0x7b   :  { %1388 = vmatprep.subr.bf16.mxu1 %v1623_v39 }
  0x7c   :  { %771 = vmatpush1.bf16.msra.mxu0 %v1542_v18 }
  0x7d   :  { %772 = vmatprep.subr.bf16.mxu0 %v1550_v19 }
  0x7e   :  { %1389 = vmatpush3.bf16.msra.mxu1 %v1624_v42 }
  0x7f   :  { %1390 = vmatprep.subr.bf16.mxu1 %v1625_v59 }
  0x80   :  { %773 = vmatpush1.bf16.msra.mxu0 %v1548_v23 }
  0x81   :  { %774 = vmatprep.subr.bf16.mxu0 %v1556_v24  ;;  %v1631_v24 = vld [vmem:[%s1938_s5] sm:$0xff]  }
  0x82   :  { %1391 = vmatpush3.bf16.msra.mxu1 %v1626_v60 }
  0x83   :  { %1392 = vmatprep.subr.bf16.mxu1 %v1627_v61 }
  0x84   :  { %775 = vmatpush1.bf16.msra.mxu0 %v1554_v28  ;;  %v1634_v28 = vld [vmem:[%s1938_s5 + $0x18] sm:$0xff]  }
  0x85   :  { %776 = vmatprep.subr.bf16.mxu0 %v1562_v29  ;;  %v1635_v29 = vld [vmem:[%s1938_s5 + $0x20] sm:$0xff]  }
  0x86   :  { %1393 = vmatpush3.bf16.msra.mxu1 %v1628_v62 }
  0x87   :  { %1394 = vmatprep.subr.bf16.mxu1 %v1629_v63 }
  0x88   :  { %777 = vmatpush1.bf16.msra.mxu0 %v1560_v32  ;;  %v1638_v32 = vld [vmem:[%s1938_s5 + $0x38] sm:$0xff]  }
  0x89   :  { %778 = vmatprep.subr.bf16.mxu0 %v1568_v33 }
  0x8a   :  { %1395 = vmatpush3.bf16.msra.mxu1 %v1630_v0 }
  0x8b   :  { %1416 = vmatprep.subr.bf16.mxu1 %v1724_v1 }
  0x8c   :  { %779 = vmatpush1.bf16.msra.mxu0 %v1566_v36 }
  0x8d   :  { %780 = vmatprep.subr.bf16.mxu0 %v1574_v37 }
  0x90   :  { %781 = vmatpush1.bf16.msra.mxu0 %v1572_v40 }
  0x91   :  { %782 = vmatprep.subr.bf16.mxu0 %v1580_v41  ;;  %v1639_v41 = vld [vmem:[%s1940_s7] sm:$0xff]  }
  0x94   :  { %783 = vmatpush1.bf16.msra.mxu0 %v1578_v43  ;;  %v1640_v43 = vld [vmem:[%s1940_s7 + $0x8] sm:$0xff]  }
  0x95   :  { %784 = vmatprep.subr.bf16.mxu0 %v1586_v44  ;;  %v1641_v44 = vld [vmem:[%s1940_s7 + $0x10] sm:$0xff]  }
  0x98   :  { %785 = vmatpush1.bf16.msra.mxu0 %v1584_v45  ;;  %v1642_v45 = vld [vmem:[%s1940_s7 + $0x18] sm:$0xff]  }
  0x99   :  { %786 = vmatprep.subr.bf16.mxu0 %v1592_v46  ;;  %v1365_v46 = vld [vmem:[%s1939_s6] ss:$0 sm:$0xff]  ;;  %s1726_s6 = smov [#allocation7]  }
  0x9a   :  { %s1239_s7 = sshll.u32 %s1726_s6, 4  ;;  %s1240_s7 = int_to_ptr.vmem [resolvable:$true] %s1239_s7 }
  0x9b   :  { %p1696_p3 = scmp.lt.s32.totalorder %s1240_s7, %s1240_s7 }
  0x9c   :  { %787 = vmatpush1.bf16.msra.mxu0 %v1590_v47 }
  0x9d   :  { %788 = vmatprep.subr.bf16.mxu0 %v1598_v48 }
  0xa0   :  { %789 = vmatpush1.bf16.msra.mxu0 %v1596_v49 }
  0xa1   :  { %790 = vmatprep.subr.bf16.mxu0 %v1604_v50 }
  0xa4   :  { %791 = vmatpush1.bf16.msra.mxu0 %v1602_v51 }
  0xa5   :  { %801 = vmatprep.subr.bf16.mxu0 %v1610_v53 }
  0xa7   :  { %793 = vmatmul.mubr.bf16.vlgmr.msra.gmra.mrb[0].mxu0 %v71_v54  ;;  %v1374_v54 = vld [vmem:[%s1941_s8] ss:$0 sm:$0xff]  ;;  %s1691_s8 = scalar_lea.vmem %s1240_s7, 128 }
  0xa8   :  { %802 = vmatpush1.bf16.msra.mxu0 %v1608_v55  ;;  %833 = vmatprep.mubr.bf16.mxu0 %v1723_v56  ;;  %p1692_p2 = scmp.ne.s32.totalorder %s1240_s7, %s1691_s8  ;;  %p1697_p4 = scmp.lt.s32.totalorder %s1691_s8, %s1691_s8 }
  0xaa   :  { %p1698_p5 = por %p1697_p4, %p1696_p3 }
  0xac   :  { %p1699_p6 = pnand %p1698_p5, %p1692_p2 }
  0xb3   :  { %1347 = vmatmul.mubr.msk.bf16.vlgmr.msra.gmra.mrb[0].mxu0 %vm674_vm0, %v73_v58 }
 0x140   :  { %v712_v2 = vpop.f32.mrb[0].mxu1 }
 0x141   :  { %v714_v3 = vpop.f32.mrb[1].mxu1  ;;  %v713_v13 = vadd.f32 %v712_v2, %v177_v11 }
 0x142   :  { %v716_v4 = vpop.f32.mrb[2].mxu1  ;;  %v715_v14 = vadd.f32 %v714_v3, %v181_v12 }
 0x143   :  { %v717_v5 = vpop.f32.mrb[3].mxu1 }
 0x186   :  { %v835_v15 = vpop.f32.mrb[0].mxu0 }
 0x187   :  { %v1449_v16 = vadd.f32 %v835_v15, %v713_v13  ;;  %v837_v17 = vpop.f32.mrb[1].mxu0 }
 0x188   :  { %v1451_v18 = vadd.f32 %v837_v17, %v715_v14  ;;  %v839_v19 = vpop.f32.mrb[2].mxu0 }
 0x189   :  { %v842_v20 = vmax.f32 %v1449_v16, 0.0  ;;  %v840_v21 = vpop.f32.mrb[3].mxu0 }
 0x18a   :  { %v843_v22 = vmax.f32 %v1451_v18, 0.0 }
 0x18b   :  { %v844_v25 = vpack.c.bf16 %v842_v20, %v842_v20 }
 0x18c   :  { %v845_v23 = vpack.c.bf16 %v843_v22, %v843_v22 }
 0x18e   :  { %1013 = vmatprep.mubr.bf16.mxu1 %v845_v23 }
 0x18f   :  { %1014 = vmatmul.mubr.bf16.vlgmr.msra.gmra.mrb[4].mxu1 %v844_v25 }
 0x190   :  { %1417 = vmatpush3.bf16.msra.mxu1 %v1631_v24  ;;  %1432 = vmatprep.mubr.msk.bf16.mxu1 %vm1725_vm1, %v1724_v1 }
 0x191   :  { %1418 = vmatprep.subr.bf16.mxu1 %v1724_v1 }
 0x194   :  { %1419 = vmatpush3.bf16.msra.mxu1 %v1632_v26 }
 0x195   :  { %1420 = vmatprep.subr.bf16.mxu1 %v1724_v1 }
 0x198   :  { %1421 = vmatpush3.bf16.msra.mxu1 %v1633_v27 }
 0x199   :  { %1422 = vmatprep.subr.bf16.mxu1 %v1724_v1 }
 0x19c   :  { %1423 = vmatpush3.bf16.msra.mxu1 %v1634_v28 }
 0x19d   :  { %1424 = vmatprep.subr.bf16.mxu1 %v1724_v1 }
 0x1a0   :  { %1425 = vmatpush3.bf16.msra.mxu1 %v1635_v29 }
 0x1a1   :  { %1426 = vmatprep.subr.bf16.mxu1 %v1724_v1 }
 0x1a4   :  { %1427 = vmatpush3.bf16.msra.mxu1 %v1636_v30 }
 0x1a5   :  { %1428 = vmatprep.subr.bf16.mxu1 %v1724_v1 }
 0x1a8   :  { %1429 = vmatpush3.bf16.msra.mxu1 %v1637_v31 }
 0x1a9   :  { %1430 = vmatprep.subr.bf16.mxu1 %v1724_v1 }
 0x1ac   :  { %1431 = vmatpush3.bf16.msra.mxu1 %v1638_v32 }
 0x1ad   :  { %1436 = vmatprep.subr.bf16.mxu1 %v1724_v1 }
 0x262   :  { %v1396_v33 = vpop.f32.mrb[4].mxu1 }
 0x263   :  { %v1397_v35 = vpop.f32.mrb[5].mxu1 }
 0x264   :  { %v1398_v36 = vadd.f32 %v1397_v35, %v1396_v33  ;;  %v1399_v37 = vpop.f32.mrb[6].mxu1 }
 0x265   :  { %v1400_v38 = vpop.f32.mrb[7].mxu1 }
 0x266   :  { %v1016_v39 = vadd.f32 %v1398_v36, %v1348_v34 }
 0x268   :  { %v1021_v40 = vmax.f32 %v1016_v39, 0.0 }
 0x26a   :  { %v1022_v42 = vpack.c.bf16 %v1021_v40, %v1021_v40 }
 0x26c   :  { %1433 = vmatmul.mubr.bf16.vlgmr.msra.gmra.mrb[8].mxu1 %v1022_v42 }
 0x26d   :  { %1437 = vmatpush3.bf16.msra.mxu1 %v1639_v41  ;;  %1444 = vmatprep.mubr.msk.bf16.mxu1 %vm1725_vm1, %v1724_v1 }
 0x26e   :  { %1438 = vmatprep.subr.bf16.mxu1 %v1724_v1 }
 0x271   :  { %1439 = vmatpush3.bf16.msra.mxu1 %v1640_v43 }
 0x272   :  { %1440 = vmatprep.subr.bf16.mxu1 %v1724_v1 }
 0x275   :  { %1441 = vmatpush3.bf16.msra.mxu1 %v1641_v44 }
 0x276   :  { %1442 = vmatprep.subr.bf16.mxu1 %v1724_v1 }
 0x279   :  { %1443 = vmatpush3.bf16.msra.mxu1 %v1642_v45 }
 0x33f   :  { %v1128_v47 = vpop.f32.mrb[8].mxu1 }
 0x340   :  { %v1129_v48 = vadd.f32 %v1365_v46, %v1128_v47  ;;  %v1434_v49 = vpop.f32.mrb[9].mxu1 }
 0x341   :  { %v1131_v50 = vpop.f32.mrb[10].mxu1 }
 0x342   :  { %v1134_v51 = vmax.f32 %v1129_v48, 0.0  ;;  %v1435_v52 = vpop.f32.mrb[11].mxu1 }
 0x344   :  { %v1135_v53 = vpack.c.bf16 %v1134_v51, %v1134_v51 }
 0x346   :  { %1445 = vmatmul.mubr.msk.bf16.vlgmr.msra.gmra.mrb[12].mxu1 %vm1175_vm2, %v1135_v53 }
 0x419   :  { %v1213_v55 = vpop.f32.mrb[12].mxu1 }
 0x41a   :  { %v1214_v56 = vadd.f32 %v1374_v54, %v1213_v55  ;;  %v1446_v57 = vpop.f32.mrb[13].mxu1 }
 0x41b   :  { %v1216_v58 = vpop.f32.mrb[14].mxu1 }
 0x41c   :  { %v1447_v59 = vpop.f32.mrb[15].mxu1  ;;  %v1220_v60 = vsel %vm1219_vm3, %v1214_v56, -inf }
 0x41d   :  { %1221 = vmax.xlane.f32.xlu0 %v1220_v60 }
 0x4aa   :  { %v1222_v61 = vpop.xlane.xlu0 %1221 }
 0x4ab   :  { %v1223_v62 = vsub.f32 %v1214_v56, %v1222_v61 }
 0x4ad   :  { %v1224_v63 = vmul.f32 1.442695, %v1223_v62 }
 0x4af   :  { %1643 = vpow2.f32 %v1224_v63 }
 0x4b9   :  { %v1644_v0 = vpop.eup %1643 }
 0x4ba   :  { %v1226_v1 = vsel %vm1219_vm3, %v1644_v0, 0.0 }
 0x4bb   :  { %1227 = vadd.xlane.f32.xlu0 %v1226_v1 }
 0x548   :  { %v1228_v2 = vpop.xlane.xlu0 %1227 }
 0x549   :  { %1645 = vlog2.f32 %v1228_v2 }
 0x553   :  { %v1646_v3 = vpop.eup %1645 }
 0x554   :  { %v1230_v4 = vmul.f32 0.6931472, %v1646_v3 }
 0x556   :  { %v1231_v5 = vsub.f32 %v1223_v62, %v1230_v4 }
 0x558   :  { %1232 = vst.msk [vmem:[#allocation7] sm:$0xff] %vm1219_vm3, %v1231_v5 }
 0x559   :  { %1702 = shalt.err (!%p1699_p6)
}
 0x55a   :  { %s1703_s26 = scalar_lea.hbm %s1942_s9, 128 }
 0x55b   :  { %p1704_p7 = scmp.ne.s32.totalorder %s1942_s9, %s1703_s26  ;;  %p1707_p8 = scmp.lt.u32.totalorder %s1703_s26, %s1942_s9 }
 0x55d   :  { %p1709_p9 = pnand %p1707_p8, %p1704_p7 }
 0x55f   :  { %1712 = shalt.err (!%p1709_p9)
}
 0x560   :  { %1242 = dma.vmem_to_hbm [thread:$0]  %s1240_s7, 128, %s1942_s9, [#allocation4]  }
 0x561   :  { %1717 = dma.done.wait [#allocation4], 128  }
 0x562   :  { %1718 = vsyncadd [#allocation4], 4294967168 }
 0x563   :  { %1246 = vsyncpa [#allocation3], 1 }
 0x564   :  { %1247 = vsyncpa [#allocation6], 1 }
 0x565   :  { %1248 = vsyncpa [#allocation4], 1 }

</bundles_post_ra>
